<compile_context>
chip_gen: v5e
topology: v5e:2x2
jax: 0.10.0
libtpu: 0.0.40
codegen_flags: <defaults>
</compile_context>

<pallas_src>
import functools

import jax
import jax.numpy as jnp
from jax import lax
from jax.experimental import pallas as pl
from jax.experimental.pallas import tpu as pltpu

_NEG_BIG = -1e30          # plain Python float -> inlined jaxpr literal (no captured consts)

# Optional v6e/v7x micro-opt from the review: do the exp in bf16 (EUP bf16 path,
# ~2x exp throughput). Leave False for portability (v5e has no bf16 EUP).
EXP_IN_BF16 = False


def _instance_loss_kernel(zq_ref, zkT_ref, lse_ref, m_ref, l_ref,
                          *, t_q, t_kv, n_real, n_pad, exp_in_bf16=False):
    qi = pl.program_id(0)        # resident row tile
    kv = pl.program_id(1)        # streamed key tile (reduction axis, innermost)
    n_groups = t_kv // 128

    @pl.when(kv == 0)
    def _init():
        m_ref[...] = jnp.full((t_q, 128), -jnp.inf, jnp.float32)
        l_ref[...] = jnp.zeros((t_q, 128), jnp.float32)

    # (T_q, Dp) bf16 x (Dp, T_kv) bf16 -> (T_q, T_kv) f32 on the MXU.
    # zq already carries the 1/temperature scale -> no N^2 divide.
    s = jnp.dot(zq_ref[...], zkT_ref[...], preferred_element_type=jnp.float32)

    def _online_update(scores):
        # Per-lane (T_q, 128) online logsumexp: all per-tile reductions are plain
        # VALU max/add between 128-lane groups (no XLU cross-lane reduce, no
        # (T,1)->(T,T_kv) lane broadcast). Cross-lane work is deferred to finalize.
        groups = [scores[:, g * 128:(g + 1) * 128] for g in range(n_groups)]
        m_prev = m_ref[...]
        tile_max = groups[0]
        for g in groups[1:]:
            tile_max = jnp.maximum(tile_max, g)
        m_new = jnp.maximum(m_prev, tile_max)
        acc = jnp.exp(m_prev - m_new) * l_ref[...]
        for g in groups:
            d = g - m_new
            if exp_in_bf16:                      # static flag (v6e/v7x only)
                d = d.astype(jnp.bfloat16)
            acc = acc + jnp.exp(d).astype(jnp.float32)
        m_ref[...] = m_new
        l_ref[...] = acc

    # Masking is needed only on tiles that touch the diagonal (self-similarity)
    # or, when N was padded, on the last key tile (padded columns). Every other
    # tile takes the mask-free path, and the mask is fused into the value chain
    # (no extra scratch load-modify-store pass over the score tile).
    row0 = qi * t_q
    col0 = kv * t_kv
    needs_mask = jnp.logical_and(col0 < row0 + t_q, row0 < col0 + t_kv)
    if n_pad != n_real:          # static Python condition
        needs_mask = jnp.logical_or(needs_mask, kv == pl.num_programs(1) - 1)

    @pl.when(needs_mask)
    def _masked():
        rows = row0 + lax.broadcasted_iota(jnp.int32, (t_q, t_kv), 0)
        cols = col0 + lax.broadcasted_iota(jnp.int32, (t_q, t_kv), 1)
        kill = rows == cols
        if n_pad != n_real:
            kill = jnp.logical_or(kill, cols >= n_real)
        _online_update(jnp.where(kill, _NEG_BIG, s))

    @pl.when(jnp.logical_not(needs_mask))
    def _unmasked():
        _online_update(s)

    @pl.when(kv == pl.num_programs(1) - 1)
    def _finalize():
        # Single cross-lane combine per row tile:
        #   lse = m + log( sum_l l_l * exp(m_l - m) ),  m = max_l m_l
        m_lane = m_ref[...]
        l_lane = l_ref[...]
        m_row = jnp.max(m_lane, axis=-1, keepdims=True)              # (T_q, 1)
        lse_ref[...] = m_row + jnp.log(
            jnp.sum(l_lane * jnp.exp(m_lane - m_row), axis=-1, keepdims=True))


def _round_up(x, m):
    return ((x + m - 1) // m) * m


def _choose_tiles(n_pad, d_pad, vmem_budget=20 * 1024 * 1024):
    """Pick (T_q resident row tile, T_kv streamed key tile)."""
    # Streamed key tile: multiple of 128; larger amortizes the per-lane rescale exp.
    t_kv = 128
    for cand in (512, 256):
        if n_pad % cand == 0:
            t_kv = cand
            break

    def fits(t_q):
        zq = 2 * t_q * d_pad * 2          # resident query tile (double-buffered bf16)
        zk = 2 * d_pad * t_kv * 2         # streamed key tile (double-buffered bf16)
        score = 2 * t_q * t_kv * 4        # dot result + fused elementwise temps (f32)
        ml = 2 * t_q * 128 * 4            # per-lane max/sum accumulators
        return zq + zk + score + ml <= vmem_budget

    # Resident row tile: as large as the budget allows (HBM re-streaming of the
    # keys scales as N^2*Dp / T_q), ...
    t_q = 128
    for cand in (2048, 1024, 512, 256, 128):
        if n_pad % cand == 0 and fits(cand):
            t_q = cand
            break
    # ... but keep >= 2 row tiles when possible so v7x's second TensorCore has work.
    if n_pad // t_q < 2:
        for cand in (1024, 512, 256, 128):
            if cand < t_q and n_pad % cand == 0 and n_pad // cand >= 2 and fits(cand):
                t_q = cand
                break
    return t_q, t_kv


def instance_loss(z_i, z_j, temperature):
    """z_i, z_j: (B, D) arrays. Returns the scalar InstanceLoss (float32)."""
    assert z_i.shape == z_j.shape and z_i.ndim == 2
    B, D = z_i.shape
    N = 2 * B
    inv_temp = 1.0 / float(temperature)

    z = jnp.concatenate([z_i, z_j], axis=0).astype(jnp.float32)        # (N, D)
    zpart = jnp.concatenate([z_j, z_i], axis=0).astype(jnp.float32)    # partner rows

    # Positive term in the wrapper: O(N*D) rowwise f32 reduce (kernel only returns lse).
    pos = jnp.sum(z * zpart, axis=-1) * inv_temp                       # (N,)

    # Lane-friendly padding of both axes (zero feature padding does not change any
    # dot product; padded key columns are masked in-kernel; padded rows dropped below).
    Dp = _round_up(D, 128)
    Np = _round_up(N, 128)
    zp = z
    if Dp != D or Np != N:
        zp = jnp.pad(z, ((0, Np - N), (0, Dp - D)))

    # Fold 1/temperature into the query operand; bf16 MXU inputs, f32 accumulate.
    zq = (zp * inv_temp).astype(jnp.bfloat16)                          # (Np, Dp)
    zkT = zp.T.astype(jnp.bfloat16)                                    # (Dp, Np)

    t_q, t_kv = _choose_tiles(Np, Dp)
    grid = (Np // t_q, Np // t_kv)

    kernel = functools.partial(
        _instance_loss_kernel,
        t_q=t_q, t_kv=t_kv, n_real=N, n_pad=Np, exp_in_bf16=EXP_IN_BF16)

    cost = pl.CostEstimate(
        flops=2 * Np * Np * Dp,
        transcendentals=Np * Np,
        bytes_accessed=(Np // t_q) * Np * Dp * 2 + Np * Dp * 2 + Np * 4,
    )

    lse = pl.pallas_call(
        kernel,
        out_shape=jax.ShapeDtypeStruct((Np, 1), jnp.float32),
        grid_spec=pltpu.PrefetchScalarGridSpec(
            num_scalar_prefetch=0,
            grid=grid,
            in_specs=[
                pl.BlockSpec((t_q, Dp), lambda qi, kv: (qi, 0)),   # resident query tile
                pl.BlockSpec((Dp, t_kv), lambda qi, kv: (0, kv)),  # streamed key tile
            ],
            out_specs=pl.BlockSpec((t_q, 1), lambda qi, kv: (qi, 0)),
            scratch_shapes=[
                pltpu.VMEM((t_q, 128), jnp.float32),   # per-lane running max
                pltpu.VMEM((t_q, 128), jnp.float32),   # per-lane running sum
            ],
        ),
        compiler_params=pltpu.CompilerParams(
            dimension_semantics=("parallel", "arbitrary"),
            vmem_limit_bytes=32 * 1024 * 1024,
        ),
        cost_estimate=cost,
    )(zq, zkT)

    return jnp.sum(lse[:N, 0] - pos) / jnp.float32(N)


if __name__ == "__main__":
    batch_size = 8
    hidden = 32
    temperature = 0.5

    key = jax.random.PRNGKey(0)
    k1, k2 = jax.random.split(key)
    z_i = jax.random.normal(k1, (batch_size, hidden), dtype=jnp.float32)
    z_j = jax.random.normal(k2, (batch_size, hidden), dtype=jnp.float32)

    loss = instance_loss(z_i, z_j, temperature)
    jax.block_until_ready(loss)

    # Pure-JAX f32 reference mirroring the PyTorch forward:
    #   logits_i = [sim[i, partner(i)]] ++ {sim[i, j] : j != i, partner(i)}
    #   CrossEntropyLoss(label=0, reduction='sum') / N
    # which equals sum_i (logsumexp_{j != i} sim[i, j] - sim[i, partner(i)]) / N,
    # because the partner similarity appears exactly once among the logits.
    N = 2 * batch_size
    z = jnp.concatenate([z_i, z_j], axis=0)
    sim = (z @ z.T) / temperature
    pos = jnp.concatenate([jnp.diagonal(sim, batch_size),
                           jnp.diagonal(sim, -batch_size)])
    sim_no_self = jnp.where(jnp.eye(N, dtype=bool), -jnp.inf, sim)
    ref = jnp.sum(jax.nn.logsumexp(sim_no_self, axis=1) - pos) / N

    # Kernel does the N^2 matmul in bf16 (f32 accumulate) -> compare at bf16 tolerance.
    assert jnp.allclose(loss, ref, rtol=2e-2, atol=2e-2), (loss, ref)
    print("KERNEL_OK")
</pallas_src>

<mosaic_0001>
module attributes {stable_mosaic.version = 11 : i64} {
  func.func @_instance_loss_kernel(%arg0: i32, %arg1: i32, %arg2: memref<128x128xbf16, #tpu.memory_space<vmem>>, %arg3: memref<128x128xbf16, #tpu.memory_space<vmem>>, %arg4: memref<128x1xf32, #tpu.memory_space<vmem>>, %arg5: memref<128x128xf32, #tpu.memory_space<vmem>>, %arg6: memref<128x128xf32, #tpu.memory_space<vmem>>) attributes {dimension_semantics = [#tpu.dimension_semantics<parallel>, #tpu.dimension_semantics<arbitrary>], iteration_bounds = array<i64: 1, 1>, scalar_prefetch = 0 : i64, scratch_operands = 2 : i64, tpu.core_type = #tpu.core_type<tc>, window_params = [{transform_indices = @transform_0, window_bounds = array<i64: 128, 128>}, {transform_indices = @transform_1, window_bounds = array<i64: 128, 128>}, {transform_indices = @transform_2, window_bounds = array<i64: 128, 1>}]} {
    %c0_i32 = arith.constant 0 : i32
    %0 = arith.cmpi eq, %arg1, %c0_i32 : i32
    %1 = arith.extui %0 : i1 to i32
    %c0_i32_0 = arith.constant 0 : i32
    %2 = arith.cmpi ne, %1, %c0_i32_0 : i32
    scf.if %2 {
      %cst_12 = arith.constant 0xFF800000 : f32
      %23 = vector.broadcast %cst_12 : f32 to vector<128x128xf32>
      %c0_13 = arith.constant 0 : index
      %c0_14 = arith.constant 0 : index
      %24 = vector.load %arg5[%c0_13, %c0_14] : memref<128x128xf32, #tpu.memory_space<vmem>>, vector<128x128xf32>
      tpu.vector_store %arg5[%c0_13, %c0_14], %23 {strides = array<i32>} : memref<128x128xf32, #tpu.memory_space<vmem>>, vector<128x128xf32>,
      %cst_15 = arith.constant 0.000000e+00 : f32
      %25 = vector.broadcast %cst_15 : f32 to vector<128x128xf32>
      %c0_16 = arith.constant 0 : index
      %c0_17 = arith.constant 0 : index
      %26 = vector.load %arg6[%c0_16, %c0_17] : memref<128x128xf32, #tpu.memory_space<vmem>>, vector<128x128xf32>
      tpu.vector_store %arg6[%c0_16, %c0_17], %25 {strides = array<i32>} : memref<128x128xf32, #tpu.memory_space<vmem>>, vector<128x128xf32>,
    } else {
    }
    %c0 = arith.constant 0 : index
    %c0_1 = arith.constant 0 : index
    %3 = vector.load %arg2[%c0, %c0_1] : memref<128x128xbf16, #tpu.memory_space<vmem>>, vector<128x128xbf16>
    %c0_2 = arith.constant 0 : index
    %c0_3 = arith.constant 0 : index
    %4 = vector.load %arg3[%c0_2, %c0_3] : memref<128x128xbf16, #tpu.memory_space<vmem>>, vector<128x128xbf16>
    %cst = arith.constant dense<0.000000e+00> : vector<128x128xf32>
    %5 = tpu.matmul %3, %4, %cst {dimension_numbers = #tpu.dot_dimension_numbers<[1], [0], [0], [1], [0, 0, 1, 1], [], []>} : vector<128x128xbf16>, vector<128x128xbf16>, vector<128x128xf32> -> vector<128x128xf32>
    %c128_i32 = arith.constant 128 : i32
    %6 = arith.muli %arg0, %c128_i32 : i32
    %c128_i32_4 = arith.constant 128 : i32
    %7 = arith.muli %arg1, %c128_i32_4 : i32
    %c128_i32_5 = arith.constant 128 : i32
    %8 = arith.addi %6, %c128_i32_5 : i32
    %9 = arith.cmpi slt, %7, %8 : i32
    %c128_i32_6 = arith.constant 128 : i32
    %10 = arith.addi %7, %c128_i32_6 : i32
    %11 = arith.cmpi slt, %6, %10 : i32
    %12 = arith.andi %9, %11 : i1
    %c0_i32_7 = arith.constant 0 : i32
    %13 = arith.cmpi eq, %arg1, %c0_i32_7 : i32
    %14 = arith.ori %12, %13 : i1
    %15 = arith.extui %14 : i1 to i32
    %c0_i32_8 = arith.constant 0 : i32
    %16 = arith.cmpi ne, %15, %c0_i32_8 : i32
    scf.if %16 {
      %23 = tpu.iota {dimensions = array<i32: 0>} : vector<128x128xi32>
      %24 = vector.broadcast %6 : i32 to vector<128x128xi32>
      %25 = arith.addi %24, %23 : vector<128x128xi32>
      %26 = tpu.iota {dimensions = array<i32: 1>} : vector<128x128xi32>
      %27 = vector.broadcast %7 : i32 to vector<128x128xi32>
      %28 = arith.addi %27, %26 : vector<128x128xi32>
      %29 = arith.cmpi eq, %25, %28 : vector<128x128xi32>
      %c16_i32 = arith.constant 16 : i32
      %30 = vector.broadcast %c16_i32 : i32 to vector<128x128xi32>
      %31 = arith.cmpi sge, %28, %30 : vector<128x128xi32>
      %32 = arith.ori %29, %31 : vector<128x128xi1>
      %cst_12 = arith.constant -1.000000e+30 : f32
      %33 = vector.broadcast %cst_12 : f32 to vector<128x128xf32>
      %34 = arith.select %32, %33, %5 : vector<128x128xi1>, vector<128x128xf32>
      %c0_13 = arith.constant 0 : index
      %c0_14 = arith.constant 0 : index
      %35 = vector.load %arg5[%c0_13, %c0_14] : memref<128x128xf32, #tpu.memory_space<vmem>>, vector<128x128xf32>
      %36 = arith.maximumf %35, %34 : vector<128x128xf32>
      %37 = arith.subf %35, %36 : vector<128x128xf32>
      %38 = math.exp %37 : vector<128x128xf32>
      %c0_15 = arith.constant 0 : index
      %c0_16 = arith.constant 0 : index
      %39 = vector.load %arg6[%c0_15, %c0_16] : memref<128x128xf32, #tpu.memory_space<vmem>>, vector<128x128xf32>
      %40 = arith.mulf %38, %39 : vector<128x128xf32>
      %41 = arith.subf %34, %36 : vector<128x128xf32>
      %42 = math.exp %41 : vector<128x128xf32>
      %43 = arith.addf %40, %42 : vector<128x128xf32>
      %c0_17 = arith.constant 0 : index
      %c0_18 = arith.constant 0 : index
      %44 = vector.load %arg5[%c0_17, %c0_18] : memref<128x128xf32, #tpu.memory_space<vmem>>, vector<128x128xf32>
      tpu.vector_store %arg5[%c0_17, %c0_18], %36 {strides = array<i32>} : memref<128x128xf32, #tpu.memory_space<vmem>>, vector<128x128xf32>,
      %c0_19 = arith.constant 0 : index
      %c0_20 = arith.constant 0 : index
      %45 = vector.load %arg6[%c0_19, %c0_20] : memref<128x128xf32, #tpu.memory_space<vmem>>, vector<128x128xf32>
      tpu.vector_store %arg6[%c0_19, %c0_20], %43 {strides = array<i32>} : memref<128x128xf32, #tpu.memory_space<vmem>>, vector<128x128xf32>,
    } else {
    }
    %true = arith.constant true
    %17 = arith.xori %14, %true : i1
    %18 = arith.extui %17 : i1 to i32
    %c0_i32_9 = arith.constant 0 : i32
    %19 = arith.cmpi ne, %18, %c0_i32_9 : i32
    scf.if %19 {
      %c0_12 = arith.constant 0 : index
      %c0_13 = arith.constant 0 : index
      %23 = vector.load %arg5[%c0_12, %c0_13] : memref<128x128xf32, #tpu.memory_space<vmem>>, vector<128x128xf32>
      %24 = arith.maximumf %23, %5 : vector<128x128xf32>
      %25 = arith.subf %23, %24 : vector<128x128xf32>
      %26 = math.exp %25 : vector<128x128xf32>
      %c0_14 = arith.constant 0 : index
      %c0_15 = arith.constant 0 : index
      %27 = vector.load %arg6[%c0_14, %c0_15] : memref<128x128xf32, #tpu.memory_space<vmem>>, vector<128x128xf32>
      %28 = arith.mulf %26, %27 : vector<128x128xf32>
      %29 = arith.subf %5, %24 : vector<128x128xf32>
      %30 = math.exp %29 : vector<128x128xf32>
      %31 = arith.addf %28, %30 : vector<128x128xf32>
      %c0_16 = arith.constant 0 : index
      %c0_17 = arith.constant 0 : index
      %32 = vector.load %arg5[%c0_16, %c0_17] : memref<128x128xf32, #tpu.memory_space<vmem>>, vector<128x128xf32>
      tpu.vector_store %arg5[%c0_16, %c0_17], %24 {strides = array<i32>} : memref<128x128xf32, #tpu.memory_space<vmem>>, vector<128x128xf32>,
      %c0_18 = arith.constant 0 : index
      %c0_19 = arith.constant 0 : index
      %33 = vector.load %arg6[%c0_18, %c0_19] : memref<128x128xf32, #tpu.memory_space<vmem>>, vector<128x128xf32>
      tpu.vector_store %arg6[%c0_18, %c0_19], %31 {strides = array<i32>} : memref<128x128xf32, #tpu.memory_space<vmem>>, vector<128x128xf32>,
    } else {
    }
    %c0_i32_10 = arith.constant 0 : i32
    %20 = arith.cmpi eq, %arg1, %c0_i32_10 : i32
    %21 = arith.extui %20 : i1 to i32
    %c0_i32_11 = arith.constant 0 : i32
    %22 = arith.cmpi ne, %21, %c0_i32_11 : i32
    scf.if %22 {
      %c0_12 = arith.constant 0 : index
      %c0_13 = arith.constant 0 : index
      %23 = vector.load %arg5[%c0_12, %c0_13] : memref<128x128xf32, #tpu.memory_space<vmem>>, vector<128x128xf32>
      %c0_14 = arith.constant 0 : index
      %c0_15 = arith.constant 0 : index
      %24 = vector.load %arg6[%c0_14, %c0_15] : memref<128x128xf32, #tpu.memory_space<vmem>>, vector<128x128xf32>
      %cst_16 = arith.constant dense<0xFF800000> : vector<128xf32>
      %25 = vector.multi_reduction <maximumf>, %23, %cst_16 [1] : vector<128x128xf32> to vector<128xf32>
      %26 = vector.shape_cast %25 : vector<128xf32> to vector<128x1xf32>
      %27 = vector.broadcast %26 : vector<128x1xf32> to vector<128x128xf32>
      %28 = arith.subf %23, %27 : vector<128x128xf32>
      %29 = math.exp %28 : vector<128x128xf32>
      %30 = arith.mulf %24, %29 : vector<128x128xf32>
      %cst_17 = arith.constant dense<0.000000e+00> : vector<128xf32>
      %31 = vector.multi_reduction <add>, %30, %cst_17 [1] : vector<128x128xf32> to vector<128xf32>
      %32 = vector.shape_cast %31 : vector<128xf32> to vector<128x1xf32>
      %33 = math.log %32 : vector<128x1xf32>
      %34 = arith.addf %26, %33 : vector<128x1xf32>
      %c0_18 = arith.constant 0 : index
      %c0_19 = arith.constant 0 : index
      %35 = vector.load %arg4[%c0_18, %c0_19] : memref<128x1xf32, #tpu.memory_space<vmem>>, vector<128x1xf32>
      tpu.vector_store %arg4[%c0_18, %c0_19], %34 {strides = array<i32>} : memref<128x1xf32, #tpu.memory_space<vmem>>, vector<128x1xf32>,
    } else {
    }
    return
  }
  func.func @transform_0(%arg0: i32, %arg1: i32) -> (i32, i32) {
    %c0_i32 = arith.constant 0 : i32
    %c0_i32_0 = arith.constant 0 : i32
    return %arg0, %c0_i32 : i32, i32
  }
  func.func @transform_1(%arg0: i32, %arg1: i32) -> (i32, i32) {
    %c0_i32 = arith.constant 0 : i32
    %c0_i32_0 = arith.constant 0 : i32
    return %c0_i32, %arg1 : i32, i32
  }
  func.func @transform_2(%arg0: i32, %arg1: i32) -> (i32, i32) {
    %c0_i32 = arith.constant 0 : i32
    %c0_i32_0 = arith.constant 0 : i32
    return %arg0, %c0_i32 : i32, i32
  }
}

</mosaic_0001>

<bundles_post_ra>
// kernel: tpu_custom_call.1
= control target key start
LH: loop header
LB: loop body
LE: loop exit
PB: predicated region body
PF: predicated region fallthrough
CT: control target
= control target key end

     0   :  { %7 = vsyncpa [#allocation5], 0  ;;  %s1633_s0 = inlined_call_operand.hbm [shape: bf16[128,128], index: 0, kind: input, shape index: {}]   ;;  %s1634_s1 = inlined_call_operand.hbm [shape: bf16[128,128], index: 1, kind: input, shape index: {}]   ;;  %s1635_s2 = inlined_call_operand.vmem [shape: f32[128,1], index: 2, kind: output, shape index: {}]  }
   0x1   :  { %s13_s11 = sshll.u32 %s1633_s0, 4  ;;  %s14_s11 = int_to_ptr.hbm [resolvable:$true] %s13_s11 }
   0x2   :  { %8 = vsyncpa [#allocation7], 0  ;;  %s1296_s12 = smov [#allocation4]   ;;  %s26_s16 = sshll.u32 %s1634_s1, 4  ;;  %s27_s16 = int_to_ptr.hbm [resolvable:$true] %s26_s16 }
   0x3   :  { %s15_s13 = sshll.u32 %s1296_s12, 4  ;;  %s1297_s17 = smov 64   ;;  %s16_s13 = int_to_ptr.vmem [resolvable:$true] %s15_s13 }
   0x4   :  { %s1298_s18 = smov 4   ;;  %s1299_s19 = smov [#allocation6]  }
   0x5   :  { %21 = dma.hbm_to_vmem [thread:$0]  %s14_s11, 1024, %s16_s13, [#allocation5], %s1297_s17, %s1297_s17, %s1298_s18  }
   0x6   :  { %s28_s20 = sshll.u32 %s1299_s19, 4  ;;  %s29_s20 = int_to_ptr.vmem [resolvable:$true] %s28_s20 }
   0x7   :  { %34 = dma.hbm_to_vmem [thread:$0]  %s27_s16, 1024, %s29_s20, [#allocation7], %s1297_s17, %s1297_s17, %s1298_s18  }
   0x8   :  { %1292 = dma.done.wait [#allocation5], 1024  }
   0x9   :  { %1293 = vsyncadd [#allocation5], 4294966272 }
   0xa   :  { %1294 = dma.done.wait [#allocation7], 1024  }
   0xb   :  { %1295 = vsyncadd [#allocation7], 4294966272  ;;  %v1087_v0 = vld [vmem:[#allocation6 + $0x38] sm:$0xff]  ;;  %v1086_v1 = vld [vmem:[#allocation6 + $0x30] sm:$0xff]  ;;  %v268_v16 = vlaneseq }
   0xc   :  { %207 = vmatpush.bf16.msra.mxu0 %v1087_v0  ;;  %1088 = vmatpush.bf16.msra.mxu1 %v1087_v0  ;;  %v1085_v2 = vld [vmem:[#allocation6 + $0x28] sm:$0xff]  ;;  %v1084_v3 = vld [vmem:[#allocation6 + $0x20] sm:$0xff]  ;;  %v1083_v4 = vld [vmem:[#allocation6 + $0x18] sm:$0xff] }
   0xd   :  { %1089 = vmatpush.bf16.msra.mxu2 %v1087_v0  ;;  %1090 = vmatpush.bf16.msra.mxu3 %v1087_v0  ;;  %v1082_v5 = vld [vmem:[#allocation6 + $0x10] sm:$0xff]  ;;  %v1081_v6 = vld [vmem:[#allocation6 + $0x8] sm:$0xff]  ;;  %v1080_v7 = vld [vmem:[#allocation6] sm:$0xff]  ;;  %v1321_v17 = vshrl.u32 %v268_v16, 7  ;;  %v1323_v18 = vand.u32 127, %v268_v16 }
   0xe   :  { %v1072_v8 = vld [vmem:[#allocation4] sm:$0xff]  ;;  %v1074_v9 = vld [vmem:[#allocation4 + $0x10] sm:$0xff]  ;;  %v1073_v12 = vld [vmem:[#allocation4 + $0x8] sm:$0xff] }
   0xf   :  { %v1076_v10 = vld [vmem:[#allocation4 + $0x20] sm:$0xff]  ;;  %v1078_v11 = vld [vmem:[#allocation4 + $0x30] sm:$0xff]  ;;  %v1075_v13 = vld [vmem:[#allocation4 + $0x18] sm:$0xff]  ;;  %v273_v19 = vadd.s32 32, %v1321_v17  ;;  %vm306_vm0 = vcmp.eq.s32.totalorder %v1321_v17, %v1323_v18  ;;  %vm322_vm1 = vcmp.ge.s32.totalorder %v1323_v18, 16  ;;  %v277_v20 = vadd.s32 64, %v1321_v17 }
  0x10   :  { %208 = vmatpush.bf16.msra.mxu0 %v1086_v1  ;;  %1091 = vmatpush.bf16.msra.mxu1 %v1086_v1  ;;  %v1077_v14 = vld [vmem:[#allocation4 + $0x28] sm:$0xff]  ;;  %v1079_v15 = vld [vmem:[#allocation4 + $0x38] sm:$0xff]  ;;  %vm323_vm3 = vmor %vm306_vm0, %vm322_vm1  ;;  %v281_v21 = vadd.s32 96, %v1321_v17  ;;  %v270_v26 = vadd.s32 8, %v1321_v17  ;;  %v274_v29 = vadd.s32 40, %v1321_v17  ;;  %v271_v31 = vadd.s32 16, %v1321_v17 }
  0x11   :  { %1092 = vmatpush.bf16.msra.mxu2 %v1086_v1  ;;  %1093 = vmatpush.bf16.msra.mxu3 %v1086_v1  ;;  %vm310_vm2 = vcmp.eq.s32.totalorder %v273_v19, %v1323_v18  ;;  %vm314_vm5 = vcmp.eq.s32.totalorder %v277_v20, %v1323_v18  ;;  %v278_v36 = vadd.s32 72, %v1321_v17  ;;  %v279_v38 = vadd.s32 80, %v1321_v17 }
  0x12   :  { %vm327_vm4 = vmor %vm310_vm2, %vm322_vm1  ;;  %vm318_vm6 = vcmp.eq.s32.totalorder %v281_v21, %v1323_v18  ;;  %vm307_vm9 = vcmp.eq.s32.totalorder %v270_v26, %v1323_v18  ;;  %vm311_vm10 = vcmp.eq.s32.totalorder %v274_v29, %v1323_v18  ;;  %vm308_vm11 = vcmp.eq.s32.totalorder %v271_v31, %v1323_v18 }
  0x13   :  { %vm331_vm7 = vmor %vm314_vm5, %vm322_vm1  ;;  %vm315_vm15 = vcmp.eq.s32.totalorder %v278_v36, %v1323_v18  ;;  %vm316_vm0 = vcmp.eq.s32.totalorder %v279_v38, %v1323_v18  ;;  %v280_v43 = vadd.s32 88, %v1321_v17  ;;  %v275_v44 = vadd.s32 48, %v1321_v17 }
  0x14   :  { %209 = vmatpush.bf16.msra.mxu0 %v1085_v2  ;;  %1094 = vmatpush.bf16.msra.mxu1 %v1085_v2  ;;  %vm335_vm8 = vmor %vm318_vm6, %vm322_vm1  ;;  %v272_v46 = vadd.s32 24, %v1321_v17  ;;  %v283_v50 = vadd.s32 112, %v1321_v17  ;;  %v284_v54 = vadd.s32 120, %v1321_v17  ;;  %v276_v55 = vadd.s32 56, %v1321_v17 }
  0x15   :  { %1095 = vmatpush.bf16.msra.mxu2 %v1085_v2  ;;  %1096 = vmatpush.bf16.msra.mxu3 %v1085_v2  ;;  %vm324_vm12 = vmor %vm307_vm9, %vm322_vm1  ;;  %vm312_vm5 = vcmp.eq.s32.totalorder %v275_v44, %v1323_v18  ;;  %v282_v62 = vadd.s32 104, %v1321_v17 }
  0x16   :  { %vm328_vm13 = vmor %vm311_vm10, %vm322_vm1  ;;  %vm309_vm6 = vcmp.eq.s32.totalorder %v272_v46, %v1323_v18  ;;  %vm320_vm10 = vcmp.eq.s32.totalorder %v283_v50, %v1323_v18 }
  0x17   :  { %vm325_vm14 = vmor %vm308_vm11, %vm322_vm1 }
  0x18   :  { %210 = vmatpush.bf16.msra.mxu0 %v1084_v3  ;;  %1097 = vmatpush.bf16.msra.mxu1 %v1084_v3  ;;  %vm332_vm2 = vmor %vm315_vm15, %vm322_vm1 }
  0x19   :  { %1098 = vmatpush.bf16.msra.mxu2 %v1084_v3  ;;  %1099 = vmatpush.bf16.msra.mxu3 %v1084_v3  ;;  %vm326_vm9 = vmor %vm309_vm6, %vm322_vm1 }
  0x1a   :  { %vm337_vm11 = vmor %vm320_vm10, %vm322_vm1 }
  0x1c   :  { %211 = vmatpush.bf16.msra.mxu0 %v1083_v4  ;;  %1100 = vmatpush.bf16.msra.mxu1 %v1083_v4 }
  0x1d   :  { %1101 = vmatpush.bf16.msra.mxu2 %v1083_v4  ;;  %1102 = vmatpush.bf16.msra.mxu3 %v1083_v4 }
  0x20   :  { %212 = vmatpush.bf16.msra.mxu0 %v1082_v5  ;;  %1103 = vmatpush.bf16.msra.mxu1 %v1082_v5 }
  0x21   :  { %1104 = vmatpush.bf16.msra.mxu2 %v1082_v5  ;;  %1105 = vmatpush.bf16.msra.mxu3 %v1082_v5 }
  0x24   :  { %213 = vmatpush.bf16.msra.mxu0 %v1081_v6  ;;  %1106 = vmatpush.bf16.msra.mxu1 %v1081_v6 }
  0x25   :  { %1107 = vmatpush.bf16.msra.mxu2 %v1081_v6  ;;  %1108 = vmatpush.bf16.msra.mxu3 %v1081_v6 }
  0x28   :  { %214 = vmatpush.bf16.msra.mxu0 %v1080_v7  ;;  %1109 = vmatpush.bf16.msra.mxu1 %v1080_v7 }
  0x29   :  { %1110 = vmatpush.bf16.msra.mxu2 %v1080_v7  ;;  %1111 = vmatpush.bf16.msra.mxu3 %v1080_v7 }
  0x2b   :  { %215 = vmatmul.bf16.vlgmr.msra.gmra.mxu0 %v1072_v8  ;;  %225 = vmatmul.bf16.vlgmr.msra.gmra.mxu1 %v1074_v9 }
  0x2c   :  { %235 = vmatmul.bf16.vlgmr.msra.gmra.mxu2 %v1076_v10  ;;  %245 = vmatmul.bf16.vlgmr.msra.gmra.mxu3 %v1078_v11 }
  0x3b   :  { %220 = vmatmul.bf16.gmra.mxu0 %v1073_v12  ;;  %230 = vmatmul.bf16.gmra.mxu1 %v1075_v13 }
  0x3c   :  { %240 = vmatmul.bf16.gmra.mxu2 %v1077_v14  ;;  %250 = vmatmul.bf16.gmra.mxu3 %v1079_v15 }
  0xa8   :  { %v216_v22 = vpop.f32.mrf.mxu0  ;;  %v226_v23 = vpop.f32.mrf.mxu1 }
  0xa9   :  { %v1336_v24 = vsel %vm323_vm3, -1e+30, %v216_v22  ;;  %v1338_v25 = vsel %vm327_vm4, -1e+30, %v226_v23  ;;  %vm333_vm3 = vmor %vm316_vm0, %vm322_vm1  ;;  %vm317_vm4 = vcmp.eq.s32.totalorder %v280_v43, %v1323_v18  ;;  %vm319_vm0 = vcmp.eq.s32.totalorder %v282_v62, %v1323_v18 }
  0xaa   :  { %817 = vmax.xlane.f32.xlu2 %v1338_v25  ;;  %809 = vmax.xlane.f32.xlu0 %v1336_v24  ;;  %v391_v2 = vsub.f32 -inf, %v1338_v25  ;;  %v387_v3 = vsub.f32 -inf, %v1336_v24  ;;  %v471_v5 = vsub.f32 %v1338_v25, %v1338_v25  ;;  %v467_v7 = vsub.f32 %v1336_v24, %v1336_v24 }
  0xac   :  { %v411_v4 = vmul.f32 1.442695, %v391_v2  ;;  %v403_v6 = vmul.f32 1.442695, %v387_v3  ;;  %v491_v10 = vmul.f32 1.442695, %v471_v5 }
  0xad   :  { %v483_v11 = vmul.f32 1.442695, %v467_v7 }
  0xae   :  { %1116 = vpow2.f32 %v411_v4 }
  0xaf   :  { %v236_v27 = vpop.f32.mrf.mxu2  ;;  %v246_v28 = vpop.f32.mrf.mxu3  ;;  %1118 = vpow2.f32 %v403_v6 }
  0xb0   :  { %v218_v30 = vpop.f32.mrf.mxu0  ;;  %v1351_v32 = vsel %vm331_vm7, -1e+30, %v236_v27  ;;  %v1353_v33 = vsel %vm335_vm8, -1e+30, %v246_v28  ;;  %v228_v34 = vpop.f32.mrf.mxu1  ;;  %vm334_vm7 = vmor %vm317_vm4, %vm322_vm1  ;;  %1120 = vpow2.f32 %v491_v10 }
  0xb1   :  { %v1368_v39 = vsel %vm324_vm12, -1e+30, %v218_v30  ;;  %v1370_v40 = vsel %vm328_vm13, -1e+30, %v228_v34  ;;  %vm329_vm8 = vmor %vm312_vm5, %vm322_vm1  ;;  %vm321_vm12 = vcmp.eq.s32.totalorder %v284_v54, %v1323_v18  ;;  %vm313_vm13 = vcmp.eq.s32.totalorder %v276_v55, %v1323_v18 }
  0xb2   :  { %825 = vmax.xlane.f32.xlu2 %v1351_v32  ;;  %833 = vmax.xlane.f32.xlu0 %v1353_v33  ;;  %vm330_vm15 = vmor %vm313_vm13, %vm322_vm1  ;;  %v395_v8 = vsub.f32 -inf, %v1351_v32  ;;  %v399_v9 = vsub.f32 -inf, %v1353_v33  ;;  %v475_v16 = vsub.f32 %v1351_v32, %v1351_v32  ;;  %1122 = vpow2.f32 %v483_v11 }
  0xb3   :  { %v479_v19 = vsub.f32 %v1353_v33, %v1353_v33  ;;  %v388_v21 = vsub.f32 -inf, %v1368_v39  ;;  %v392_v27 = vsub.f32 -inf, %v1370_v40 }
  0xb4   :  { %v419_v12 = vmul.f32 1.442695, %v395_v8  ;;  %v427_v13 = vmul.f32 1.442695, %v399_v9  ;;  %v1117_v20 = vpop.eup %1116  ;;  %v499_v28 = vmul.f32 1.442695, %v475_v16 }
  0xb5   :  { %v1119_v26 = vpop.eup %1118  ;;  %v455_v29 = vmul.f32 0.0, %v1117_v20  ;;  %v405_v31 = vmul.f32 1.442695, %v388_v21  ;;  %v413_v36 = vmul.f32 1.442695, %v392_v27 }
  0xb6   :  { %1124 = vpow2.f32 %v419_v12  ;;  %v1121_v30 = vpop.eup %1120  ;;  %v451_v34 = vmul.f32 0.0, %v1119_v26 }
  0xb7   :  { %v238_v35 = vpop.f32.mrf.mxu2  ;;  %v248_v42 = vpop.f32.mrf.mxu3  ;;  %1126 = vpow2.f32 %v427_v13 }
  0xb8   :  { %v221_v37 = vpop.f32.mrf.mxu0  ;;  %v1386_v47 = vsel %vm332_vm2, -1e+30, %v238_v35  ;;  %v231_v51 = vpop.f32.mrf.mxu1  ;;  %vm336_vm2 = vmor %vm319_vm0, %vm322_vm1 }
  0xb9   :  { %v1372_v41 = vsel %vm325_vm14, -1e+30, %v221_v37  ;;  %v1407_v57 = vsel %vm329_vm8, -1e+30, %v231_v51  ;;  %vm338_vm14 = vmor %vm321_vm12, %vm322_vm1  ;;  %v1435_v1 = vsel %vm336_vm2, -1e+30, %v248_v42  ;;  %v1123_v35 = vpop.eup %1122  ;;  %v472_v37 = vsub.f32 %v1370_v40, %v1370_v40 }
  0xba   :  { %819 = vmax.xlane.f32.xlu2 %v1370_v40  ;;  %811 = vmax.xlane.f32.xlu0 %v1368_v39  ;;  %v396_v44 = vsub.f32 -inf, %v1386_v47  ;;  %v389_v51 = vsub.f32 -inf, %v1372_v41  ;;  %v476_v4 = vsub.f32 %v1386_v47, %v1386_v47  ;;  %v400_v10 = vsub.f32 -inf, %v1435_v1 }
  0xbb   :  { %813 = vmax.xlane.f32.xlu1 %v1372_v41  ;;  %v493_v62 = vmul.f32 1.442695, %v472_v37  ;;  %v469_v11 = vsub.f32 %v1372_v41, %v1372_v41  ;;  %v473_v37 = vsub.f32 %v1407_v57, %v1407_v57  ;;  %vm985_vm1 = vcmask 7168  }
  0xbc   :  { %v1125_v43 = vpop.eup %1124  ;;  %v421_v3 = vmul.f32 1.442695, %v396_v44  ;;  %v407_v5 = vmul.f32 1.442695, %v389_v51 }
  0xbd   :  { %v459_v6 = vmul.f32 0.0, %v1125_v43 }
  0xbf   :  { %v241_v45 = vpop.f32.mrf.mxu2  ;;  %v251_v49 = vpop.f32.mrf.mxu3 }
  0xc0   :  { %v1388_v48 = vsel %vm333_vm3, -1e+30, %v241_v45  ;;  %v223_v52 = vpop.f32.mrf.mxu0  ;;  %v1418_v59 = vsel %vm337_vm11, -1e+30, %v251_v49  ;;  %v233_v61 = vpop.f32.mrf.mxu1 }
  0xc1   :  { %v1410_v58 = vsel %vm326_vm9, -1e+30, %v223_v52  ;;  %v1428_v0 = vsel %vm330_vm15, -1e+30, %v233_v61  ;;  %v1127_v49 = vpop.eup %1126  ;;  %v519_v52 = vadd.f32 %v1121_v30, %v455_v29  ;;  %v397_v2 = vsub.f32 -inf, %v1388_v48 }
  0xc2   :  { %827 = vmax.xlane.f32.xlu0 %v1386_v47  ;;  %v463_v8 = vmul.f32 0.0, %v1127_v49  ;;  %v477_v26 = vsub.f32 %v1388_v48, %v1388_v48 }
  0xc3   :  { %829 = vmax.xlane.f32.xlu1 %v1388_v48  ;;  %v423_v12 = vmul.f32 1.442695, %v397_v2 }
  0xc7   :  { %v243_v53 = vpop.f32.mrf.mxu2  ;;  %v253_v60 = vpop.f32.mrf.mxu3 }
  0xc8   :  { %v1404_v56 = vsel %vm334_vm7, -1e+30, %v243_v53  ;;  %v1425_v63 = vsel %vm338_vm14, -1e+30, %v253_v60  ;;  %v515_v60 = vadd.f32 %v1123_v35, %v451_v34 }
  0xc9   :  { %831 = vmax.xlane.f32.xlu2 %v1404_v56 }
  0xca   :  { %821 = vmax.xlane.f32.xlu0 %v1407_v57 }
  0xcb   :  { %815 = vmax.xlane.f32.xlu1 %v1410_v58 }
  0xd1   :  { %837 = vmax.xlane.f32.xlu2 %v1418_v59 }
  0xd2   :  { %839 = vmax.xlane.f32.xlu0 %v1425_v63 }
  0xd3   :  { %823 = vmax.xlane.f32.xlu1 %v1428_v0 }
  0xdb   :  { %835 = vmax.xlane.f32.xlu1 %v1435_v1 }
 0x11d   :  { %v1446_v14 = vpop.xlane.xlu2 %817  ;;  %v1448_v15 = vpop.xlane.xlu0 %809 }
 0x11e   :  { %v845_v17 = vsub.f32 %v1338_v25, %v1446_v14  ;;  %v841_v18 = vsub.f32 %v1336_v24, %v1448_v15  ;;  %v507_v25 = vmul.f32 1.442695, %v479_v19  ;;  %v468_v24 = vsub.f32 %v1368_v39, %v1368_v39 }
 0x120   :  { %v865_v22 = vmul.f32 1.442695, %v845_v17  ;;  %v857_v23 = vmul.f32 1.442695, %v841_v18  ;;  %v485_v50 = vmul.f32 1.442695, %v468_v24 }
 0x121   :  { %v393_v18 = vsub.f32 -inf, %v1407_v57 }
 0x122   :  { %1128 = vpow2.f32 %v865_v22 }
 0x123   :  { %1130 = vpow2.f32 %v857_v23  ;;  %v501_v23 = vmul.f32 1.442695, %v476_v4 }
 0x124   :  { %1132 = vpow2.f32 %v499_v28 }
 0x125   :  { %v1464_v38 = vpop.xlane.xlu2 %825  ;;  %v1466_v42 = vpop.xlane.xlu0 %833  ;;  %1134 = vpow2.f32 %v507_v25 }
 0x126   :  { %v849_v45 = vsub.f32 %v1351_v32, %v1464_v38  ;;  %v853_v46 = vsub.f32 %v1353_v33, %v1466_v42  ;;  %1136 = vpow2.f32 %v405_v31  ;;  %v487_v31 = vmul.f32 1.442695, %v469_v11 }
 0x127   :  { %1138 = vpow2.f32 %v413_v36  ;;  %v415_v36 = vmul.f32 1.442695, %v393_v18 }
 0x128   :  { %v1129_v53 = vpop.eup %1128  ;;  %v873_v54 = vmul.f32 1.442695, %v849_v45  ;;  %v881_v55 = vmul.f32 1.442695, %v853_v46  ;;  %v503_v45 = vmul.f32 1.442695, %v477_v26 }
 0x129   :  { %v1131_v61 = vpop.eup %1130  ;;  %v893_v32 = vmul.f32 %v1129_v53, %v519_v52  ;;  %v429_v52 = vmul.f32 1.442695, %v400_v10 }
 0x12a   :  { %1140 = vpow2.f32 %v873_v54  ;;  %v889_v33 = vmul.f32 %v1131_v61, %v515_v60  ;;  %v1133_v7 = vpop.eup %1132  ;;  %v390_v60 = vsub.f32 -inf, %v1410_v58 }
 0x12b   :  { %1142 = vpow2.f32 %v881_v55  ;;  %913 = vadd.xlane.f32.xlu2 %v893_v32  ;;  %v1135_v9 = vpop.eup %1134  ;;  %v523_v27 = vadd.f32 %v1133_v7, %v459_v6  ;;  %v495_v55 = vmul.f32 1.442695, %v473_v37  ;;  %v401_v32 = vsub.f32 -inf, %v1418_v59 }
 0x12c   :  { %1144 = vpow2.f32 %v485_v50  ;;  %905 = vadd.xlane.f32.xlu1 %v889_v33  ;;  %v1137_v17 = vpop.eup %1136  ;;  %v527_v30 = vadd.f32 %v1135_v9, %v463_v8 }
 0x12d   :  { %1146 = vpow2.f32 %v493_v62  ;;  %v1480_v13 = vpop.xlane.xlu2 %819  ;;  %v1482_v16 = vpop.xlane.xlu0 %811  ;;  %v452_v50 = vmul.f32 0.0, %v1137_v17  ;;  %v394_v17 = vsub.f32 -inf, %v1428_v0 }
 0x12e   :  { %1148 = vpow2.f32 %v421_v3  ;;  %v846_v19 = vsub.f32 %v1370_v40, %v1480_v13  ;;  %v842_v20 = vsub.f32 %v1368_v39, %v1482_v16  ;;  %v1489_v21 = vpop.xlane.xlu1 %813  ;;  %v1139_v22 = vpop.eup %1138  ;;  %v398_v39 = vsub.f32 -inf, %v1404_v56 }
 0x12f   :  { %1150 = vpow2.f32 %v407_v5  ;;  %v843_v29 = vsub.f32 %v1372_v41, %v1489_v21  ;;  %v456_v46 = vmul.f32 0.0, %v1139_v22  ;;  %v478_v5 = vsub.f32 %v1404_v56, %v1404_v56 }
 0x130   :  { %v1141_v28 = vpop.eup %1140  ;;  %v867_v25 = vmul.f32 1.442695, %v846_v19  ;;  %v859_v24 = vmul.f32 1.442695, %v842_v20  ;;  %1152 = vpow2.f32 %v423_v12  ;;  %v425_v53 = vmul.f32 1.442695, %v398_v39 }
 0x131   :  { %v1143_v40 = vpop.eup %1142  ;;  %v897_v34 = vmul.f32 %v1141_v28, %v523_v27  ;;  %v861_v49 = vmul.f32 1.442695, %v843_v29  ;;  %v409_v12 = vmul.f32 1.442695, %v390_v60  ;;  %v431_v19 = vmul.f32 1.442695, %v401_v32 }
 0x132   :  { %v1145_v35 = vpop.eup %1144  ;;  %1154 = vpow2.f32 %v867_v25  ;;  %v901_v43 = vmul.f32 %v1143_v40, %v527_v30  ;;  %v505_v26 = vmul.f32 1.442695, %v478_v5  ;;  %v474_v29 = vsub.f32 %v1428_v0, %v1428_v0 }
 0x133   :  { %v1147_v44 = vpop.eup %1146  ;;  %1156 = vpow2.f32 %v859_v24  ;;  %921 = vadd.xlane.f32.xlu0 %v897_v34  ;;  %v516_v7 = vadd.f32 %v1145_v35, %v452_v50  ;;  %v417_v39 = vmul.f32 1.442695, %v394_v17  ;;  %v481_v34 = vsub.f32 %v1418_v59, %v1418_v59 }
 0x134   :  { %v1149_v41 = vpop.eup %1148  ;;  %1158 = vpow2.f32 %v501_v23  ;;  %929 = vadd.xlane.f32.xlu1 %v901_v43  ;;  %v520_v33 = vadd.f32 %v1147_v44, %v456_v46  ;;  %v402_v60 = vsub.f32 -inf, %v1425_v63 }
 0x135   :  { %v1151_v51 = vpop.eup %1150  ;;  %1160 = vpow2.f32 %v487_v31  ;;  %v1498_v54 = vpop.xlane.xlu0 %827  ;;  %v460_v22 = vmul.f32 0.0, %v1149_v41 }
 0x136   :  { %1162 = vpow2.f32 %v415_v36  ;;  %v850_v61 = vsub.f32 %v1386_v47, %v1498_v54  ;;  %v1503_v62 = vpop.xlane.xlu1 %829  ;;  %v1153_v2 = vpop.eup %1152  ;;  %v470_v47 = vsub.f32 %v1410_v58, %v1410_v58  ;;  %v453_v20 = vmul.f32 0.0, %v1151_v51 }
 0x137   :  { %1164 = vpow2.f32 %v503_v45  ;;  %v851_v3 = vsub.f32 %v1388_v48, %v1503_v62  ;;  %v461_v28 = vmul.f32 0.0, %v1153_v2  ;;  %v497_v51 = vmul.f32 1.442695, %v474_v29 }
 0x138   :  { %v1155_v4 = vpop.eup %1154  ;;  %1166 = vpow2.f32 %v861_v49  ;;  %v875_v6 = vmul.f32 1.442695, %v850_v61  ;;  %v489_v24 = vmul.f32 1.442695, %v470_v47  ;;  %v433_v47 = vmul.f32 1.442695, %v402_v60 }
 0x139   :  { %v1157_v8 = vpop.eup %1156  ;;  %1168 = vpow2.f32 %v425_v53  ;;  %v877_v9 = vmul.f32 1.442695, %v851_v3  ;;  %v894_v10 = vmul.f32 %v1155_v4, %v520_v33 }
 0x13a   :  { %v1159_v11 = vpop.eup %1158  ;;  %1170 = vpow2.f32 %v875_v6  ;;  %v890_v48 = vmul.f32 %v1157_v8, %v516_v7 }
 0x13b   :  { %v1161_v18 = vpop.eup %1160  ;;  %1172 = vpow2.f32 %v877_v9  ;;  %915 = vadd.xlane.f32.xlu0 %v894_v10  ;;  %v524_v45 = vadd.f32 %v1159_v11, %v460_v22  ;;  %v482_v9 = vsub.f32 %v1425_v63, %v1425_v63 }
 0x13c   :  { %v1163_v23 = vpop.eup %1162  ;;  %1174 = vpow2.f32 %v429_v52  ;;  %v1513_v27 = vpop.xlane.xlu2 %831  ;;  %907 = vadd.xlane.f32.xlu2 %v890_v48  ;;  %v517_v44 = vadd.f32 %v1161_v18, %v453_v20 }
 0x13d   :  { %v1165_v25 = vpop.eup %1164  ;;  %1176 = vpow2.f32 %v495_v55  ;;  %v852_v30 = vsub.f32 %v1404_v56, %v1513_v27  ;;  %v1519_v40 = vpop.xlane.xlu0 %821  ;;  %v511_v55 = vmul.f32 1.442695, %v481_v34  ;;  %v457_v3 = vmul.f32 0.0, %v1163_v23 }
 0x13e   :  { %v1167_v31 = vpop.eup %1166  ;;  %1178 = vpow2.f32 %v409_v12  ;;  %v847_v35 = vsub.f32 %v1407_v57, %v1519_v40  ;;  %v1525_v36 = vpop.xlane.xlu1 %815  ;;  %v525_v49 = vadd.f32 %v1165_v25, %v461_v28 }
 0x13f   :  { %v1169_v37 = vpop.eup %1168  ;;  %1180 = vpow2.f32 %v431_v19  ;;  %v879_v43 = vmul.f32 1.442695, %v852_v30  ;;  %v844_v41 = vsub.f32 %v1410_v58, %v1525_v36  ;;  %v891_v52 = vmul.f32 %v1167_v31, %v517_v44 }
 0x140   :  { %v1171_v46 = vpop.eup %1170  ;;  %1182 = vpow2.f32 %v505_v26  ;;  %v869_v56 = vmul.f32 1.442695, %v847_v35  ;;  %v462_v32 = vmul.f32 0.0, %v1169_v37 }
 0x141   :  { %v1173_v50 = vpop.eup %1172  ;;  %1184 = vpow2.f32 %v879_v43  ;;  %v898_v53 = vmul.f32 %v1171_v46, %v524_v45  ;;  %v863_v33 = vmul.f32 1.442695, %v844_v41 }
 0x142   :  { %v1529_v57 = vpop.eup %1174  ;;  %1186 = vpow2.f32 %v869_v56  ;;  %v899_v61 = vmul.f32 %v1173_v50, %v525_v49 }
 0x143   :  { %v1177_v2 = vpop.eup %1176  ;;  %1188 = vpow2.f32 %v417_v39  ;;  %909 = vadd.xlane.f32.xlu0 %v891_v52  ;;  %923 = vadd.xlane.f32.xlu1 %v898_v53 }
 0x144   :  { %v1179_v58 = vpop.eup %1178  ;;  %1190 = vpow2.f32 %v489_v24  ;;  %v1532_v4 = vpop.xlane.xlu2 %837  ;;  %925 = vadd.xlane.f32.xlu2 %v899_v61  ;;  %v521_v18 = vadd.f32 %v1177_v2, %v457_v3  ;;  %v513_v24 = vmul.f32 1.442695, %v482_v9  ;;  %v464_v61 = vmul.f32 0.0, %v1529_v57 }
 0x145   :  { %v1181_v5 = vpop.eup %1180  ;;  %1192 = vpow2.f32 %v497_v51  ;;  %v855_v6 = vsub.f32 %v1418_v59, %v1532_v4  ;;  %v1536_v7 = vpop.xlane.xlu0 %839  ;;  %v480_v59 = vsub.f32 %v1435_v1, %v1435_v1  ;;  %v454_v30 = vmul.f32 0.0, %v1179_v58 }
 0x146   :  { %v1183_v8 = vpop.eup %1182  ;;  %1194 = vpow2.f32 %v511_v55  ;;  %v1540_v10 = vpop.xlane.xlu1 %823  ;;  %v856_v20 = vsub.f32 %v1425_v63, %v1536_v7 }
 0x147   :  { %v1185_v11 = vpop.eup %1184  ;;  %v885_v12 = vmul.f32 1.442695, %v855_v6  ;;  %v848_v17 = vsub.f32 %v1428_v0, %v1540_v10  ;;  %v526_v48 = vadd.f32 %v1183_v8, %v462_v32  ;;  %1196 = vpow2.f32 %v863_v33 }
 0x148   :  { %v1187_v19 = vpop.eup %1186  ;;  %v465_v0 = vmul.f32 0.0, %v1181_v5  ;;  %v887_v39 = vmul.f32 1.442695, %v856_v20  ;;  %v509_v35 = vmul.f32 1.442695, %v480_v59 }
 0x149   :  { %v1189_v22 = vpop.eup %1188  ;;  %1198 = vpow2.f32 %v885_v12  ;;  %v871_v23 = vmul.f32 1.442695, %v848_v17  ;;  %v900_v26 = vmul.f32 %v1185_v11, %v526_v48  ;;  %v895_v28 = vmul.f32 %v1187_v19, %v521_v18 }
 0x14a   :  { %v1191_v25 = vpop.eup %1190  ;;  %1200 = vpow2.f32 %v433_v47  ;;  %v458_v34 = vmul.f32 0.0, %v1189_v22 }
 0x14b   :  { %v1193_v29 = vpop.eup %1192  ;;  %1202 = vpow2.f32 %v871_v23  ;;  %927 = vadd.xlane.f32.xlu0 %v900_v26  ;;  %917 = vadd.xlane.f32.xlu1 %v895_v28  ;;  %v518_v46 = vadd.f32 %v1191_v25, %v454_v30 }
 0x14c   :  { %v1195_v31 = vpop.eup %1194  ;;  %1204 = vpow2.f32 %v513_v24  ;;  %v522_v41 = vadd.f32 %v1193_v29, %v458_v34 }
 0x14d   :  { %v1197_v37 = vpop.eup %1196  ;;  %v529_v45 = vadd.f32 %v1195_v31, %v465_v0  ;;  %1206 = vpow2.f32 %v887_v39 }
 0x14e   :  { %v1548_v63 = vpop.xlane.xlu1 %835  ;;  %1208 = vpow2.f32 %v509_v35  ;;  %v892_v52 = vmul.f32 %v1197_v37, %v518_v46 }
 0x14f   :  { %v1199_v43 = vpop.eup %1198  ;;  %v854_v44 = vsub.f32 %v1435_v1, %v1548_v63 }
 0x150   :  { %v1201_v56 = vpop.eup %1200  ;;  %v903_v51 = vmul.f32 %v1199_v43, %v529_v45 }
 0x151   :  { %v1203_v49 = vpop.eup %1202  ;;  %v883_v50 = vmul.f32 1.442695, %v854_v44  ;;  %v466_v55 = vmul.f32 0.0, %v1201_v56 }
 0x152   :  { %v896_v53 = vmul.f32 %v1203_v49, %v522_v41  ;;  %v1205_v60 = vpop.eup %1204 }
 0x153   :  { %1210 = vpow2.f32 %v883_v50  ;;  %933 = vadd.xlane.f32.xlu0 %v903_v51  ;;  %911 = vadd.xlane.f32.xlu1 %v892_v52  ;;  %v1207_v1 = vpop.eup %1206  ;;  %v530_v32 = vadd.f32 %v1205_v60, %v466_v55 }
 0x154   :  { %919 = vadd.xlane.f32.xlu2 %v896_v53  ;;  %v1209_v2 = vpop.eup %1208 }
 0x155   :  { %v528_v3 = vadd.f32 %v1209_v2, %v464_v61  ;;  %v904_v33 = vmul.f32 %v1207_v1, %v530_v32 }
 0x159   :  { %v1211_v58 = vpop.eup %1210 }
 0x15a   :  { %v902_v5 = vmul.f32 %v1211_v58, %v528_v3 }
 0x15b   :  { %935 = vadd.xlane.f32.xlu1 %v904_v33 }
 0x15c   :  { %931 = vadd.xlane.f32.xlu2 %v902_v5 }
 0x19e   :  { %v914_v6 = vpop.xlane.xlu2 %913 }
 0x19f   :  { %1212 = vlog2.f32 %v914_v6  ;;  %v906_v8 = vpop.xlane.xlu1 %905 }
 0x1a0   :  { %1214 = vlog2.f32 %v906_v8 }
 0x1a5   :  { %v1213_v47 = vpop.eup %1212 }
 0x1a6   :  { %v1215_v9 = vpop.eup %1214  ;;  %v946_v11 = vmul.f32 0.6931472, %v1213_v47  ;;  %v922_v12 = vpop.xlane.xlu0 %921 }
 0x1a7   :  { %v938_v17 = vmul.f32 0.6931472, %v1215_v9  ;;  %1216 = vlog2.f32 %v922_v12  ;;  %v930_v57 = vpop.xlane.xlu1 %929 }
 0x1a8   :  { %v973_v48 = vadd.f32 %v946_v11, %v1446_v14  ;;  %1218 = vlog2.f32 %v930_v57 }
 0x1a9   :  { %v969_v18 = vadd.f32 %v938_v17, %v1448_v15 }
 0x1aa   :  { %990 = vst.msk [vmem:[%s1635_s2 + $0x20] sm:$0xff] %vm985_vm1, %v973_v48 }
 0x1ab   :  { %986 = vst.msk [vmem:[%s1635_s2] sm:$0xff] %vm985_vm1, %v969_v18 }
 0x1ad   :  { %v1217_v19 = vpop.eup %1216 }
 0x1ae   :  { %v1219_v59 = vpop.eup %1218  ;;  %v954_v20 = vmul.f32 0.6931472, %v1217_v19  ;;  %v916_v22 = vpop.xlane.xlu0 %915 }
 0x1af   :  { %v962_v23 = vmul.f32 0.6931472, %v1219_v59  ;;  %1220 = vlog2.f32 %v916_v22  ;;  %v908_v14 = vpop.xlane.xlu2 %907 }
 0x1b0   :  { %v977_v26 = vadd.f32 %v954_v20, %v1464_v38  ;;  %1222 = vlog2.f32 %v908_v14 }
 0x1b1   :  { %v981_v15 = vadd.f32 %v962_v23, %v1466_v42 }
 0x1b2   :  { %994 = vst.msk [vmem:[%s1635_s2 + $0x40] sm:$0xff] %vm985_vm1, %v977_v26 }
 0x1b3   :  { %998 = vst.msk [vmem:[%s1635_s2 + $0x60] sm:$0xff] %vm985_vm1, %v981_v15 }
 0x1b5   :  { %v1221_v28 = vpop.eup %1220 }
 0x1b6   :  { %v1223_v25 = vpop.eup %1222  ;;  %v948_v24 = vmul.f32 0.6931472, %v1221_v28  ;;  %v910_v29 = vpop.xlane.xlu0 %909 }
 0x1b7   :  { %v924_v0 = vpop.xlane.xlu1 %923  ;;  %v940_v30 = vmul.f32 0.6931472, %v1223_v25  ;;  %v926_v38 = vpop.xlane.xlu2 %925  ;;  %1224 = vlog2.f32 %v910_v29 }
 0x1b8   :  { %v974_v42 = vadd.f32 %v948_v24, %v1480_v13  ;;  %1226 = vlog2.f32 %v926_v38 }
 0x1b9   :  { %v970_v31 = vadd.f32 %v940_v30, %v1482_v16  ;;  %1228 = vlog2.f32 %v924_v0 }
 0x1ba   :  { %991 = vst.msk [vmem:[%s1635_s2 + $0x28] sm:$0xff] %vm985_vm1, %v974_v42 }
 0x1bb   :  { %987 = vst.msk [vmem:[%s1635_s2 + $0x8] sm:$0xff] %vm985_vm1, %v970_v31 }
 0x1bd   :  { %v1225_v39 = vpop.eup %1224 }
 0x1be   :  { %v1227_v34 = vpop.eup %1226  ;;  %v942_v35 = vmul.f32 0.6931472, %v1225_v39  ;;  %v928_v37 = vpop.xlane.xlu0 %927 }
 0x1bf   :  { %v918_v43 = vpop.xlane.xlu1 %917  ;;  %v1229_v13 = vpop.eup %1228  ;;  %v958_v44 = vmul.f32 0.6931472, %v1227_v34  ;;  %1230 = vlog2.f32 %v928_v37 }
 0x1c0   :  { %v971_v16 = vadd.f32 %v942_v35, %v1489_v21  ;;  %v956_v45 = vmul.f32 0.6931472, %v1229_v13  ;;  %1232 = vlog2.f32 %v918_v43 }
 0x1c1   :  { %v979_v46 = vadd.f32 %v958_v44, %v1503_v62 }
 0x1c2   :  { %988 = vst.msk [vmem:[%s1635_s2 + $0x10] sm:$0xff] %vm985_vm1, %v971_v16  ;;  %v978_v56 = vadd.f32 %v956_v45, %v1498_v54 }
 0x1c3   :  { %996 = vst.msk [vmem:[%s1635_s2 + $0x50] sm:$0xff] %vm985_vm1, %v979_v46 }
 0x1c4   :  { %995 = vst.msk [vmem:[%s1635_s2 + $0x48] sm:$0xff] %vm985_vm1, %v978_v56 }
 0x1c5   :  { %v1231_v21 = vpop.eup %1230 }
 0x1c6   :  { %v1233_v41 = vpop.eup %1232  ;;  %v960_v62 = vmul.f32 0.6931472, %v1231_v21  ;;  %v934_v49 = vpop.xlane.xlu0 %933 }
 0x1c7   :  { %v912_v50 = vpop.xlane.xlu1 %911  ;;  %v950_v51 = vmul.f32 0.6931472, %v1233_v41  ;;  %1234 = vlog2.f32 %v934_v49  ;;  %v920_v52 = vpop.xlane.xlu2 %919 }
 0x1c8   :  { %v980_v54 = vadd.f32 %v960_v62, %v1513_v27  ;;  %1236 = vlog2.f32 %v920_v52 }
 0x1c9   :  { %v975_v53 = vadd.f32 %v950_v51, %v1519_v40  ;;  %1238 = vlog2.f32 %v912_v50 }
 0x1ca   :  { %997 = vst.msk [vmem:[%s1635_s2 + $0x58] sm:$0xff] %vm985_vm1, %v980_v54 }
 0x1cb   :  { %992 = vst.msk [vmem:[%s1635_s2 + $0x30] sm:$0xff] %vm985_vm1, %v975_v53 }
 0x1cd   :  { %v1235_v55 = vpop.eup %1234 }
 0x1ce   :  { %v1237_v60 = vpop.eup %1236  ;;  %v966_v61 = vmul.f32 0.6931472, %v1235_v55 }
 0x1cf   :  { %v936_v1 = vpop.xlane.xlu1 %935  ;;  %v1239_v2 = vpop.eup %1238  ;;  %v952_v27 = vmul.f32 0.6931472, %v1237_v60 }
 0x1d0   :  { %v932_v32 = vpop.xlane.xlu2 %931  ;;  %1240 = vlog2.f32 %v936_v1  ;;  %v983_v40 = vadd.f32 %v966_v61, %v1532_v4  ;;  %v944_v3 = vmul.f32 0.6931472, %v1239_v2 }
 0x1d1   :  { %1242 = vlog2.f32 %v932_v32  ;;  %v976_v58 = vadd.f32 %v952_v27, %v1540_v10 }
 0x1d2   :  { %1000 = vst.msk [vmem:[%s1635_s2 + $0x70] sm:$0xff] %vm985_vm1, %v983_v40  ;;  %v972_v33 = vadd.f32 %v944_v3, %v1525_v36 }
 0x1d3   :  { %993 = vst.msk [vmem:[%s1635_s2 + $0x38] sm:$0xff] %vm985_vm1, %v976_v58 }
 0x1d4   :  { %989 = vst.msk [vmem:[%s1635_s2 + $0x18] sm:$0xff] %vm985_vm1, %v972_v33 }
 0x1d6   :  { %v1241_v4 = vpop.eup %1240 }
 0x1d7   :  { %v1243_v5 = vpop.eup %1242  ;;  %v968_v10 = vmul.f32 0.6931472, %v1241_v4 }
 0x1d8   :  { %v964_v6 = vmul.f32 0.6931472, %v1243_v5 }
 0x1d9   :  { %v984_v8 = vadd.f32 %v968_v10, %v1536_v7 }
 0x1da   :  { %v982_v47 = vadd.f32 %v964_v6, %v1548_v63 }
 0x1db   :  { %1001 = vst.msk [vmem:[%s1635_s2 + $0x78] sm:$0xff] %vm985_vm1, %v984_v8 }
 0x1dc   :  { %999 = vst.msk [vmem:[%s1635_s2 + $0x68] sm:$0xff] %vm985_vm1, %v982_v47 }
 0x1dd   :  { %1006 = vsyncpa [#allocation5], 1 }
 0x1de   :  { %1007 = vsyncpa [#allocation7], 1 }

</bundles_post_ra>
